<compile_context>
chip_gen: v7x
topology: tpu7x:2x2x1
jax: 0.10.0
libtpu: 0.0.40
codegen_flags: <defaults>
</compile_context>

<pallas_src>
import functools

import jax
import jax.numpy as jnp
from jax.experimental import pallas as pl
from jax.experimental.pallas import tpu as pltpu

LANE = 128     # TPU vreg lane width
SUBLANE = 8    # f32 sublanes per vreg
MAX_BLOCK_T = 8


def _round_up(n, m):
    return ((n + m - 1) // m) * m


def _largest_divisor_leq(n, cap):
    for d in range(min(n, cap), 0, -1):
        if n % d == 0:
            return d
    return 1


def _rnn_block_kernel(x_ref, h0_ref, wx_ref, wh_ref, b_ref,
                      out_ref, hfin_ref, h_scr, *, block_t, h_pad):
    """One grid step == BLOCK_T RNN timesteps. Hidden carried in VMEM scratch."""
    g = pl.program_id(0)

    # Initialize the hidden carry once (T axis is sequential / 'arbitrary').
    @pl.when(g == 0)
    def _():
        h_scr[...] = h0_ref[...]

    def step(tt, carry):
        x_t = x_ref[tt]                                   # (B_pad, I_pad)
        h = h_scr[...]                                    # (B_pad, H_pad)
        # Split "concat" matmul: cols [0:H_pad) = i2h, [H_pad:) = i2o logits.
        z = (jnp.dot(x_t, wx_ref[...], preferred_element_type=jnp.float32)
             + jnp.dot(h, wh_ref[...], preferred_element_type=jnp.float32)
             + b_ref[...])                                # (B_pad, H_pad + O_pad)

        # New hidden: padded columns stay exactly zero because the padded
        # weight rows/cols and bias there are zero.
        h_scr[...] = z[:, 0:h_pad]

        # Numerically stable log_softmax on the logit lane block only. Padded
        # logit columns carry a -1e30 bias, so no per-step masking is needed.
        logits = z[:, h_pad:]                             # (B_pad, O_pad)
        m = jnp.max(logits, axis=1, keepdims=True)
        shifted = logits - m
        lse = jnp.log(jnp.sum(jnp.exp(shifted), axis=1, keepdims=True))
        out_ref[tt] = shifted - lse
        return carry

    jax.lax.fori_loop(0, block_t, step, 0, unroll=True)

    # Final hidden lives in a constant-index output block (written back to HBM
    # only once at the end of the grid); refreshing it per block is a cheap
    # VMEM store and avoids any uninitialized-output concerns.
    hfin_ref[...] = h_scr[...]


def _prep_params(w_i2h, b_i2h, w_i2o, b_i2o, I, H, O, i_pad, h_pad, o_pad):
    """Split/transposed/padded weights for z = x @ W_x + h @ W_h + b (once)."""
    n_pad = h_pad + o_pad
    # PyTorch layout: combined = cat(x, h) -> Linear weight (out, I+H);
    # columns [0:I) multiply x, [I:I+H) multiply h.
    w_x = jnp.zeros((i_pad, n_pad), jnp.float32)
    w_x = w_x.at[0:I, 0:H].set(w_i2h[:, 0:I].T)
    w_x = w_x.at[0:I, h_pad:h_pad + O].set(w_i2o[:, 0:I].T)

    w_h = jnp.zeros((h_pad, n_pad), jnp.float32)
    w_h = w_h.at[0:H, 0:H].set(w_i2h[:, I:I + H].T)
    w_h = w_h.at[0:H, h_pad:h_pad + O].set(w_i2o[:, I:I + H].T)

    b = jnp.zeros((1, n_pad), jnp.float32)
    b = b.at[0, 0:H].set(b_i2h)
    b = b.at[0, h_pad:h_pad + O].set(b_i2o)
    # Fold the log-softmax padding mask into the bias: padded logit columns
    # get a huge negative value so max/exp/sum ignore them (no NaN possible:
    # real logit columns are always finite).
    b = b.at[0, h_pad + O:n_pad].set(-1e30)
    return w_x, w_h, b


@jax.jit
def rnn_sequence_forward(xs, h0, w_i2h, b_i2h, w_i2o, b_i2o):
    """Run the RNN cell over a whole sequence in ONE fused pallas_call.

    xs: (T, B, I), h0: (B, H).
    Returns (log-prob outputs (T, B, O), final hidden (B, H)).
    """
    T, B, I = xs.shape
    H = w_i2h.shape[0]
    O = w_i2o.shape[0]
    assert w_i2h.shape[1] == I + H and w_i2o.shape[1] == I + H

    i_pad = _round_up(I, LANE)
    h_pad = _round_up(H, LANE)
    o_pad = _round_up(O, LANE)
    n_pad = h_pad + o_pad
    b_pad = _round_up(B, SUBLANE)

    block_t = _largest_divisor_leq(T, MAX_BLOCK_T)
    n_blocks = T // block_t

    w_x, w_h, b_cat = _prep_params(w_i2h, b_i2h, w_i2o, b_i2o,
                                   I, H, O, i_pad, h_pad, o_pad)

    # Zero-pad x / h0 to full vregs (done once, loop-invariant).
    xs_pad = jnp.zeros((T, b_pad, i_pad), jnp.float32).at[:, :B, :I].set(xs)
    h0_pad = jnp.zeros((b_pad, h_pad), jnp.float32).at[:B, :H].set(h0)

    kernel = functools.partial(_rnn_block_kernel, block_t=block_t, h_pad=h_pad)

    out_pad, hfin_pad = pl.pallas_call(
        kernel,
        out_shape=(
            jax.ShapeDtypeStruct((T, b_pad, o_pad), jnp.float32),  # log-probs
            jax.ShapeDtypeStruct((b_pad, h_pad), jnp.float32),     # final hidden
        ),
        grid_spec=pltpu.PrefetchScalarGridSpec(
            num_scalar_prefetch=0,
            grid=(n_blocks,),
            in_specs=[
                pl.BlockSpec((block_t, b_pad, i_pad), lambda g: (g, 0, 0)),  # x block
                pl.BlockSpec((b_pad, h_pad), lambda g: (0, 0)),              # h0 (once)
                pl.BlockSpec((i_pad, n_pad), lambda g: (0, 0)),              # W_x (once)
                pl.BlockSpec((h_pad, n_pad), lambda g: (0, 0)),              # W_h (once)
                pl.BlockSpec((1, n_pad), lambda g: (0, 0)),                  # bias (once)
            ],
            out_specs=[
                pl.BlockSpec((block_t, b_pad, o_pad), lambda g: (g, 0, 0)),  # log-probs
                pl.BlockSpec((b_pad, h_pad), lambda g: (0, 0)),              # final hidden
            ],
            scratch_shapes=[pltpu.VMEM((b_pad, h_pad), jnp.float32)],        # hidden carry
        ),
        compiler_params=pltpu.CompilerParams(
            dimension_semantics=("arbitrary",),   # sequential recurrence
        ),
    )(xs_pad, h0_pad, w_x, w_h, b_cat)

    outputs = out_pad[:, :B, :O]       # (T, B, O) log-probs
    final_hidden = hfin_pad[:B, :H]    # (B, H)
    return outputs, final_hidden


def rnn_forward(input_data, hidden, w_i2h, b_i2h, w_i2o, b_i2o):
    """Single-step forward, semantics identical to the PyTorch RNN.forward."""
    outs, new_hidden = rnn_sequence_forward(
        input_data[None], hidden, w_i2h, b_i2h, w_i2o, b_i2o)
    return outs[0], new_hidden


def init_linear_params(key, in_features, out_features):
    """Deterministic init matching nn.Linear default (uniform +-1/sqrt(in))."""
    k_w, k_b = jax.random.split(key)
    bound = 1.0 / jnp.sqrt(jnp.float32(in_features))
    w = jax.random.uniform(k_w, (out_features, in_features),
                           minval=-bound, maxval=bound, dtype=jnp.float32)
    b = jax.random.uniform(k_b, (out_features,),
                           minval=-bound, maxval=bound, dtype=jnp.float32)
    return w, b


if __name__ == "__main__":
    input_size, hidden_size, output_size = 16, 32, 8
    batch, seq_len = 2, 8

    key = jax.random.PRNGKey(0)
    k_seq, k_i2h, k_i2o = jax.random.split(key, 3)

    xs = jax.random.normal(k_seq, (seq_len, batch, input_size), dtype=jnp.float32)
    h0 = jnp.zeros((batch, hidden_size), dtype=jnp.float32)   # initHidden()-style

    w_i2h, b_i2h = init_linear_params(k_i2h, input_size + hidden_size, hidden_size)
    w_i2o, b_i2o = init_linear_params(k_i2o, input_size + hidden_size, output_size)

    # Pure-JAX reference for one module forward step.
    def ref_step(x, h):
        combined = jnp.concatenate([x, h], axis=1)
        hid = combined @ w_i2h.T + b_i2h
        logits = combined @ w_i2o.T + b_i2o
        return jax.nn.log_softmax(logits, axis=1), hid

    # 1) Single step == PyTorch RNN.forward(input, hidden).
    out1, h1 = rnn_forward(xs[0], h0, w_i2h, b_i2h, w_i2o, b_i2o)
    jax.block_until_ready((out1, h1))
    out1_ref, h1_ref = ref_step(xs[0], h0)
    assert jnp.allclose(out1, out1_ref, atol=1e-4, rtol=1e-4), "single-step output mismatch"
    assert jnp.allclose(h1, h1_ref, atol=1e-4, rtol=1e-4), "single-step hidden mismatch"

    # 2) Fused full-sequence recurrence (one pallas_call for all T steps).
    outs, h_final = rnn_sequence_forward(xs, h0, w_i2h, b_i2h, w_i2o, b_i2o)
    jax.block_until_ready((outs, h_final))

    h = h0
    ref_outs = []
    for t in range(seq_len):
        o, h = ref_step(xs[t], h)
        ref_outs.append(o)
    ref_outs = jnp.stack(ref_outs)
    assert jnp.allclose(outs, ref_outs, atol=1e-4, rtol=1e-4), "sequence output mismatch"
    assert jnp.allclose(h_final, h, atol=1e-4, rtol=1e-4), "sequence hidden mismatch"

    print("KERNEL_OK")
</pallas_src>

<mosaic_0001>
module attributes {stable_mosaic.version = 11 : i64} {
  func.func @_rnn_block_kernel(%arg0: i32, %arg1: memref<1x8x128xf32, #tpu.memory_space<vmem>>, %arg2: memref<8x128xf32, #tpu.memory_space<vmem>>, %arg3: memref<128x256xf32, #tpu.memory_space<vmem>>, %arg4: memref<128x256xf32, #tpu.memory_space<vmem>>, %arg5: memref<1x256xf32, #tpu.memory_space<vmem>>, %arg6: memref<1x8x128xf32, #tpu.memory_space<vmem>>, %arg7: memref<8x128xf32, #tpu.memory_space<vmem>>, %arg8: memref<8x128xf32, #tpu.memory_space<vmem>>) attributes {dimension_semantics = [#tpu.dimension_semantics<arbitrary>], iteration_bounds = array<i64: 1>, scalar_prefetch = 0 : i64, scratch_operands = 1 : i64, tpu.core_type = #tpu.core_type<tc>, window_params = [{transform_indices = @transform_0, window_bounds = array<i64: 1, 8, 128>}, {pipeline_mode = #tpu.pipeline_mode<synchronous>, transform_indices = @transform_1, window_bounds = array<i64: 8, 128>}, {pipeline_mode = #tpu.pipeline_mode<synchronous>, transform_indices = @transform_2, window_bounds = array<i64: 128, 256>}, {pipeline_mode = #tpu.pipeline_mode<synchronous>, transform_indices = @transform_3, window_bounds = array<i64: 128, 256>}, {pipeline_mode = #tpu.pipeline_mode<synchronous>, transform_indices = @transform_4, window_bounds = array<i64: 1, 256>}, {transform_indices = @transform_5, window_bounds = array<i64: 1, 8, 128>}, {pipeline_mode = #tpu.pipeline_mode<synchronous>, transform_indices = @transform_6, window_bounds = array<i64: 8, 128>}]} {
    %c0_i32 = arith.constant 0 : i32
    %0 = arith.cmpi eq, %arg0, %c0_i32 : i32
    %1 = arith.extui %0 : i1 to i32
    %c0_i32_0 = arith.constant 0 : i32
    %2 = arith.cmpi ne, %1, %c0_i32_0 : i32
    scf.if %2 {
      %c0_22 = arith.constant 0 : index
      %c0_23 = arith.constant 0 : index
      %34 = vector.load %arg2[%c0_22, %c0_23] : memref<8x128xf32, #tpu.memory_space<vmem>>, vector<8x128xf32>
      %c0_24 = arith.constant 0 : index
      %c0_25 = arith.constant 0 : index
      %35 = vector.load %arg8[%c0_24, %c0_25] : memref<8x128xf32, #tpu.memory_space<vmem>>, vector<8x128xf32>
      tpu.vector_store %arg8[%c0_24, %c0_25], %34 {strides = array<i32>} : memref<8x128xf32, #tpu.memory_space<vmem>>, vector<8x128xf32>,
    } else {
    }
    %c0_i32_1 = arith.constant 0 : i32
    %3 = arith.index_cast %c0_i32_1 : i32 to index
    %c0 = arith.constant 0 : index
    %c0_2 = arith.constant 0 : index
    %4 = vector.load %arg1[%3, %c0, %c0_2] : memref<1x8x128xf32, #tpu.memory_space<vmem>>, vector<1x8x128xf32>
    %5 = vector.shape_cast %4 : vector<1x8x128xf32> to vector<8x128xf32>
    %c0_3 = arith.constant 0 : index
    %c0_4 = arith.constant 0 : index
    %6 = vector.load %arg8[%c0_3, %c0_4] : memref<8x128xf32, #tpu.memory_space<vmem>>, vector<8x128xf32>
    %c0_5 = arith.constant 0 : index
    %c0_6 = arith.constant 0 : index
    %7 = vector.load %arg3[%c0_5, %c0_6] : memref<128x256xf32, #tpu.memory_space<vmem>>, vector<128x256xf32>
    %cst = arith.constant dense<0.000000e+00> : vector<8x256xf32>
    %8 = tpu.matmul %5, %7, %cst {dimension_numbers = #tpu.dot_dimension_numbers<[1], [0], [0], [1], [0, 0, 1, 1], [], []>} : vector<8x128xf32>, vector<128x256xf32>, vector<8x256xf32> -> vector<8x256xf32>
    %c0_7 = arith.constant 0 : index
    %c0_8 = arith.constant 0 : index
    %9 = vector.load %arg4[%c0_7, %c0_8] : memref<128x256xf32, #tpu.memory_space<vmem>>, vector<128x256xf32>
    %cst_9 = arith.constant dense<0.000000e+00> : vector<8x256xf32>
    %10 = tpu.matmul %6, %9, %cst_9 {dimension_numbers = #tpu.dot_dimension_numbers<[1], [0], [0], [1], [0, 0, 1, 1], [], []>} : vector<8x128xf32>, vector<128x256xf32>, vector<8x256xf32> -> vector<8x256xf32>
    %11 = arith.addf %8, %10 : vector<8x256xf32>
    %c0_10 = arith.constant 0 : index
    %c0_11 = arith.constant 0 : index
    %12 = vector.load %arg5[%c0_10, %c0_11] : memref<1x256xf32, #tpu.memory_space<vmem>>, vector<1x256xf32>
    %13 = vector.broadcast %12 : vector<1x256xf32> to vector<8x256xf32>
    %14 = arith.addf %11, %13 : vector<8x256xf32>
    %15 = vector.extract_strided_slice %14 {offsets = [0, 0], sizes = [8, 128], strides = [1, 1]} : vector<8x256xf32> to vector<8x128xf32>
    %c0_12 = arith.constant 0 : index
    %c0_13 = arith.constant 0 : index
    %16 = vector.load %arg8[%c0_12, %c0_13] : memref<8x128xf32, #tpu.memory_space<vmem>>, vector<8x128xf32>
    tpu.vector_store %arg8[%c0_12, %c0_13], %15 {strides = array<i32>} : memref<8x128xf32, #tpu.memory_space<vmem>>, vector<8x128xf32>,
    %17 = vector.extract_strided_slice %14 {offsets = [0, 128], sizes = [8, 128], strides = [1, 1]} : vector<8x256xf32> to vector<8x128xf32>
    %cst_14 = arith.constant dense<0xFF800000> : vector<8xf32>
    %18 = vector.multi_reduction <maximumf>, %17, %cst_14 [1] : vector<8x128xf32> to vector<8xf32>
    %19 = vector.shape_cast %18 : vector<8xf32> to vector<8x1xf32>
    %20 = vector.broadcast %19 : vector<8x1xf32> to vector<8x128xf32>
    %21 = arith.subf %17, %20 : vector<8x128xf32>
    %22 = math.exp %21 : vector<8x128xf32>
    %cst_15 = arith.constant dense<0.000000e+00> : vector<8xf32>
    %23 = vector.multi_reduction <add>, %22, %cst_15 [1] : vector<8x128xf32> to vector<8xf32>
    %24 = vector.shape_cast %23 : vector<8xf32> to vector<8x1xf32>
    %25 = math.log %24 : vector<8x1xf32>
    %26 = vector.broadcast %25 : vector<8x1xf32> to vector<8x128xf32>
    %27 = arith.subf %21, %26 : vector<8x128xf32>
    %28 = arith.index_cast %c0_i32_1 : i32 to index
    %c0_16 = arith.constant 0 : index
    %c0_17 = arith.constant 0 : index
    %29 = vector.load %arg6[%28, %c0_16, %c0_17] : memref<1x8x128xf32, #tpu.memory_space<vmem>>, vector<1x8x128xf32>
    %30 = vector.shape_cast %29 : vector<1x8x128xf32> to vector<8x128xf32>
    %31 = vector.shape_cast %27 : vector<8x128xf32> to vector<1x8x128xf32>
    tpu.vector_store %arg6[%28, %c0_16, %c0_17], %31 {strides = array<i32>} : memref<1x8x128xf32, #tpu.memory_space<vmem>>, vector<1x8x128xf32>,
    %c1_i32 = arith.constant 1 : i32
    %c0_18 = arith.constant 0 : index
    %c0_19 = arith.constant 0 : index
    %32 = vector.load %arg8[%c0_18, %c0_19] : memref<8x128xf32, #tpu.memory_space<vmem>>, vector<8x128xf32>
    %c0_20 = arith.constant 0 : index
    %c0_21 = arith.constant 0 : index
    %33 = vector.load %arg7[%c0_20, %c0_21] : memref<8x128xf32, #tpu.memory_space<vmem>>, vector<8x128xf32>
    tpu.vector_store %arg7[%c0_20, %c0_21], %32 {strides = array<i32>} : memref<8x128xf32, #tpu.memory_space<vmem>>, vector<8x128xf32>,
    return
  }
  func.func @transform_0(%arg0: i32) -> (i32, i32, i32) {
    %c0_i32 = arith.constant 0 : i32
    %c0_i32_0 = arith.constant 0 : i32
    %c0_i32_1 = arith.constant 0 : i32
    return %arg0, %c0_i32, %c0_i32_0 : i32, i32, i32
  }
  func.func @transform_1(%arg0: i32) -> (i32, i32) {
    %c0_i32 = arith.constant 0 : i32
    %c0_i32_0 = arith.constant 0 : i32
    %c0_i32_1 = arith.constant 0 : i32
    return %c0_i32, %c0_i32_0 : i32, i32
  }
  func.func @transform_2(%arg0: i32) -> (i32, i32) {
    %c0_i32 = arith.constant 0 : i32
    %c0_i32_0 = arith.constant 0 : i32
    %c0_i32_1 = arith.constant 0 : i32
    return %c0_i32, %c0_i32_0 : i32, i32
  }
  func.func @transform_3(%arg0: i32) -> (i32, i32) {
    %c0_i32 = arith.constant 0 : i32
    %c0_i32_0 = arith.constant 0 : i32
    %c0_i32_1 = arith.constant 0 : i32
    return %c0_i32, %c0_i32_0 : i32, i32
  }
  func.func @transform_4(%arg0: i32) -> (i32, i32) {
    %c0_i32 = arith.constant 0 : i32
    %c0_i32_0 = arith.constant 0 : i32
    %c0_i32_1 = arith.constant 0 : i32
    return %c0_i32, %c0_i32_0 : i32, i32
  }
  func.func @transform_5(%arg0: i32) -> (i32, i32, i32) {
    %c0_i32 = arith.constant 0 : i32
    %c0_i32_0 = arith.constant 0 : i32
    %c0_i32_1 = arith.constant 0 : i32
    return %arg0, %c0_i32, %c0_i32_0 : i32, i32, i32
  }
  func.func @transform_6(%arg0: i32) -> (i32, i32) {
    %c0_i32 = arith.constant 0 : i32
    %c0_i32_0 = arith.constant 0 : i32
    %c0_i32_1 = arith.constant 0 : i32
    return %c0_i32, %c0_i32_0 : i32, i32
  }
}

</mosaic_0001>

<bundles_post_ra>
// kernel: rnn_sequence_forward.1
= control target key start
LH: loop header
LB: loop body
LE: loop exit
PB: predicated region body
PF: predicated region fallthrough
CT: control target
= control target key end

     0   :  { %v343_v3 = vmov 0.0   ;;  %s586_s3 = inlined_call_operand.vmem [shape: f32[128,256], index: 3, kind: input, shape index: {}]   ;;  %s587_s2 = inlined_call_operand.vmem [shape: f32[128,256], index: 2, kind: input, shape index: {}]   ;;  %s588_s1 = inlined_call_operand.vmem [shape: f32[8,128], index: 1, kind: input, shape index: {}]   ;;  %s589_s0 = inlined_call_operand.vmem [shape: f32[1,8,128], index: 0, kind: input, shape index: {}]   ;;  %s590_s4 = inlined_call_operand.vmem [shape: f32[1,256], index: 4, kind: input, shape index: {}]   ;;  %s591_s6 = inlined_call_operand.vmem [shape: f32[8,128], index: 6, kind: output, shape index: {1}]   ;;  %s592_s5 = inlined_call_operand.vmem [shape: f32[1,8,128], index: 5, kind: output, shape index: {0}]  }
   0x1   :  { %v63_v0 = vld [vmem:[%s586_s3 + $0x8] sm:$0xff]  ;;  %v65_v1 = vld [vmem:[%s586_s3 + $0x18] sm:$0xff]  ;;  %158 = vmatprep.mubr.f32.mxu1 %v343_v3  ;;  %229 = vmatprep.mubr.f32.mxu0 %v343_v3  ;;  %v62_v6 = vld [vmem:[%s586_s3] sm:$0xff] }
   0x2   :  { %v31_v2 = vld [vmem:[%s587_s2 + $0x8] sm:$0xff]  ;;  %v272_v4 = vpack.c.bf16 %v65_v1, %v63_v0  ;;  %v33_v5 = vld [vmem:[%s587_s2 + $0x18] sm:$0xff]  ;;  %v64_v7 = vld [vmem:[%s586_s3 + $0x10] sm:$0xff] }
   0x3   :  { %v304_v8 = vpack.c.bf16 %v33_v5, %v31_v2  ;;  %v274_v9 = vpack.c.bf16 %v64_v7, %v62_v6  ;;  %v30_v10 = vld [vmem:[%s587_s2] sm:$0xff]  ;;  %v32_v11 = vld [vmem:[%s587_s2 + $0x10] sm:$0xff]  ;;  %v67_v12 = vld [vmem:[%s586_s3 + $0x28] sm:$0xff] }
   0x4   :  { %273 = vmatprep.subr.bf16.mxu1 %v272_v4  ;;  %v306_v13 = vpack.c.bf16 %v32_v11, %v30_v10  ;;  %v69_v14 = vld [vmem:[%s586_s3 + $0x38] sm:$0xff]  ;;  %v35_v15 = vld [vmem:[%s587_s2 + $0x28] sm:$0xff]  ;;  %v66_v19 = vld [vmem:[%s586_s3 + $0x20] sm:$0xff] }
   0x5   :  { %v37_v16 = vld [vmem:[%s587_s2 + $0x38] sm:$0xff]  ;;  %305 = vmatprep.subr.bf16.mxu0 %v304_v8  ;;  %275 = vmatpush1.bf16.msra.mxu1 %v274_v9  ;;  %v276_v17 = vpack.c.bf16 %v69_v14, %v67_v12  ;;  %v68_v20 = vld [vmem:[%s586_s3 + $0x30] sm:$0xff]  ;;  %v34_v21 = vld [vmem:[%s587_s2 + $0x20] sm:$0xff] }
   0x6   :  { %v308_v18 = vpack.c.bf16 %v37_v16, %v35_v15  ;;  %307 = vmatpush1.bf16.msra.mxu0 %v306_v13  ;;  %v278_v22 = vpack.c.bf16 %v68_v20, %v66_v19  ;;  %v36_v23 = vld [vmem:[%s587_s2 + $0x30] sm:$0xff]  ;;  %v71_v24 = vld [vmem:[%s586_s3 + $0x48] sm:$0xff]  ;;  %v73_v25 = vld [vmem:[%s586_s3 + $0x58] sm:$0xff] }
   0x7   :  { %277 = vmatprep.subr.bf16.mxu1 %v276_v17  ;;  %v310_v26 = vpack.c.bf16 %v36_v23, %v34_v21  ;;  %v280_v27 = vpack.c.bf16 %v73_v25, %v71_v24  ;;  %v39_v28 = vld [vmem:[%s587_s2 + $0x48] sm:$0xff]  ;;  %v41_v29 = vld [vmem:[%s587_s2 + $0x58] sm:$0xff]  ;;  %v70_v30 = vld [vmem:[%s586_s3 + $0x40] sm:$0xff] }
   0x8   :  { %309 = vmatprep.subr.bf16.mxu0 %v308_v18  ;;  %v312_v31 = vpack.c.bf16 %v41_v29, %v39_v28  ;;  %v72_v32 = vld [vmem:[%s586_s3 + $0x50] sm:$0xff]  ;;  %v38_v33 = vld [vmem:[%s587_s2 + $0x40] sm:$0xff]  ;;  %v75_v36 = vld [vmem:[%s586_s3 + $0x68] sm:$0xff] }
   0x9   :  { %v40_v34 = vld [vmem:[%s587_s2 + $0x50] sm:$0xff]  ;;  %279 = vmatpush1.bf16.msra.mxu1 %v278_v22  ;;  %v282_v35 = vpack.c.bf16 %v72_v32, %v70_v30  ;;  %v77_v37 = vld [vmem:[%s586_s3 + $0x78] sm:$0xff]  ;;  %v43_v38 = vld [vmem:[%s587_s2 + $0x68] sm:$0xff] }
   0xa   :  { %311 = vmatpush1.bf16.msra.mxu0 %v310_v26  ;;  %281 = vmatprep.subr.bf16.mxu1 %v280_v27  ;;  %v314_v39 = vpack.c.bf16 %v40_v34, %v38_v33  ;;  %v284_v40 = vpack.c.bf16 %v77_v37, %v75_v36  ;;  %v45_v41 = vld [vmem:[%s587_s2 + $0x78] sm:$0xff]  ;;  %v74_v42 = vld [vmem:[%s586_s3 + $0x60] sm:$0xff]  ;;  %v76_v43 = vld [vmem:[%s586_s3 + $0x70] sm:$0xff] }
   0xb   :  { %313 = vmatprep.subr.bf16.mxu0 %v312_v31  ;;  %v316_v44 = vpack.c.bf16 %v45_v41, %v43_v38  ;;  %v42_v45 = vld [vmem:[%s587_s2 + $0x60] sm:$0xff]  ;;  %v44_v46 = vld [vmem:[%s587_s2 + $0x70] sm:$0xff]  ;;  %v79_v47 = vld [vmem:[%s586_s3 + $0x88] sm:$0xff]  ;;  %v286_v51 = vpack.c.bf16 %v76_v43, %v74_v42 }
   0xc   :  { %v81_v48 = vld [vmem:[%s586_s3 + $0x98] sm:$0xff]  ;;  %v47_v49 = vld [vmem:[%s587_s2 + $0x88] sm:$0xff]  ;;  %v318_v52 = vpack.c.bf16 %v44_v46, %v42_v45  ;;  %v78_v54 = vld [vmem:[%s586_s3 + $0x80] sm:$0xff] }
   0xd   :  { %v49_v50 = vld [vmem:[%s587_s2 + $0x98] sm:$0xff]  ;;  %283 = vmatpush1.bf16.msra.mxu1 %v282_v35  ;;  %v288_v53 = vpack.c.bf16 %v81_v48, %v79_v47  ;;  %v80_v55 = vld [vmem:[%s586_s3 + $0x90] sm:$0xff]  ;;  %v46_v56 = vld [vmem:[%s587_s2 + $0x80] sm:$0xff]  ;;  %v238_v35 = vlaneseq }
   0xe   :  { %315 = vmatpush1.bf16.msra.mxu0 %v314_v39  ;;  %285 = vmatprep.subr.bf16.mxu1 %v284_v40  ;;  %v320_v57 = vpack.c.bf16 %v49_v50, %v47_v49  ;;  %v48_v58 = vld [vmem:[%s587_s2 + $0x90] sm:$0xff]  ;;  %v83_v59 = vld [vmem:[%s586_s3 + $0xa8] sm:$0xff]  ;;  %v85_v60 = vld [vmem:[%s586_s3 + $0xb8] sm:$0xff]  ;;  %v290_v63 = vpack.c.bf16 %v80_v55, %v78_v54 }
   0xf   :  { %317 = vmatprep.subr.bf16.mxu0 %v316_v44  ;;  %v51_v61 = vld [vmem:[%s587_s2 + $0xa8] sm:$0xff]  ;;  %v53_v62 = vld [vmem:[%s587_s2 + $0xb8] sm:$0xff]  ;;  %v322_v0 = vpack.c.bf16 %v48_v58, %v46_v56  ;;  %v292_v1 = vpack.c.bf16 %v85_v60, %v83_v59  ;;  %v82_v2 = vld [vmem:[%s586_s3 + $0xa0] sm:$0xff]  ;;  %v239_v36 = vshrl.u32 %v238_v35, 7 }
  0x10   :  { %v84_v3 = vld [vmem:[%s586_s3 + $0xb0] sm:$0xff]  ;;  %v50_v4 = vld [vmem:[%s587_s2 + $0xa0] sm:$0xff]  ;;  %v324_v5 = vpack.c.bf16 %v53_v62, %v51_v61  ;;  %v87_v7 = vld [vmem:[%s586_s3 + $0xc8] sm:$0xff] }
  0x11   :  { %287 = vmatpush1.bf16.msra.mxu1 %v286_v51  ;;  %v52_v6 = vld [vmem:[%s587_s2 + $0xb0] sm:$0xff]  ;;  %v89_v8 = vld [vmem:[%s586_s3 + $0xd8] sm:$0xff]  ;;  %v55_v9 = vld [vmem:[%s587_s2 + $0xc8] sm:$0xff]  ;;  %v294_v11 = vpack.c.bf16 %v84_v3, %v82_v2  ;;  %v240_v37 = vsub.s32 0, %v239_v36  ;;  %v244_v39 = vsub.s32 1, %v239_v36 }
  0x12   :  { %319 = vmatpush1.bf16.msra.mxu0 %v318_v52  ;;  %289 = vmatprep.subr.bf16.mxu1 %v288_v53  ;;  %v57_v10 = vld [vmem:[%s587_s2 + $0xd8] sm:$0xff]  ;;  %v326_v12 = vpack.c.bf16 %v52_v6, %v50_v4  ;;  %v296_v13 = vpack.c.bf16 %v89_v8, %v87_v7  ;;  %v86_v14 = vld [vmem:[%s586_s3 + $0xc0] sm:$0xff]  ;;  %v88_v15 = vld [vmem:[%s586_s3 + $0xd0] sm:$0xff] }
  0x13   :  { %321 = vmatprep.subr.bf16.mxu0 %v320_v57  ;;  %v54_v16 = vld [vmem:[%s587_s2 + $0xc0] sm:$0xff]  ;;  %v328_v17 = vpack.c.bf16 %v57_v10, %v55_v9  ;;  %v56_v18 = vld [vmem:[%s587_s2 + $0xd0] sm:$0xff]  ;;  %v91_v19 = vld [vmem:[%s586_s3 + $0xe8] sm:$0xff]  ;;  %v298_v23 = vpack.c.bf16 %v88_v15, %v86_v14 }
  0x14   :  { %v93_v20 = vld [vmem:[%s586_s3 + $0xf8] sm:$0xff]  ;;  %v59_v21 = vld [vmem:[%s587_s2 + $0xe8] sm:$0xff]  ;;  %v330_v24 = vpack.c.bf16 %v56_v18, %v54_v16  ;;  %v90_v26 = vld [vmem:[%s586_s3 + $0xe0] sm:$0xff] }
  0x15   :  { %291 = vmatpush1.bf16.msra.mxu1 %v290_v63  ;;  %v61_v22 = vld [vmem:[%s587_s2 + $0xf8] sm:$0xff]  ;;  %v300_v25 = vpack.c.bf16 %v93_v20, %v91_v19  ;;  %v92_v27 = vld [vmem:[%s586_s3 + $0xf0] sm:$0xff]  ;;  %v58_v29 = vld [vmem:[%s587_s2 + $0xe0] sm:$0xff] }
  0x16   :  { %323 = vmatpush1.bf16.msra.mxu0 %v322_v0  ;;  %293 = vmatprep.subr.bf16.mxu1 %v292_v1  ;;  %v332_v28 = vpack.c.bf16 %v61_v22, %v59_v21  ;;  %v60_v30 = vld [vmem:[%s587_s2 + $0xf0] sm:$0xff]  ;;  %v302_v31 = vpack.c.bf16 %v92_v27, %v90_v26  ;;  %v26_v33 = vld [vmem:[%s588_s1] sm:$0xff] }
  0x17   :  { %325 = vmatprep.subr.bf16.mxu0 %v324_v5  ;;  %v334_v32 = vpack.c.bf16 %v60_v30, %v58_v29  ;;  %v28_v34 = vld [vmem:[%s589_s0] sm:$0xff] }
  0x18   :  { %v236_v38 = vld [vmem:[%s590_s4] sm:$0x3] }
  0x19   :  { %295 = vmatpush1.bf16.msra.mxu1 %v294_v11  ;;  %v241_v41 = vrot.slane %v236_v38, %v240_v37  ;;  %v245_v44 = vrot.slane %v236_v38, %v244_v39 }
  0x1a   :  { %327 = vmatpush1.bf16.msra.mxu0 %v326_v12  ;;  %297 = vmatprep.subr.bf16.mxu1 %v296_v13 }
  0x1b   :  { %329 = vmatprep.subr.bf16.mxu0 %v328_v17 }
  0x1d   :  { %299 = vmatpush1.bf16.msra.mxu1 %v298_v23 }
  0x1e   :  { %331 = vmatpush1.bf16.msra.mxu0 %v330_v24  ;;  %301 = vmatprep.subr.bf16.mxu1 %v300_v25 }
  0x1f   :  { %333 = vmatprep.subr.bf16.mxu0 %v332_v28 }
  0x21   :  { %303 = vmatpush1.bf16.msra.mxu1 %v302_v31 }
  0x22   :  { %335 = vmatpush1.bf16.msra.mxu0 %v334_v32 }
  0x24   :  { %159 = vmatmul.mubr.f32.vlgmr.msra.gmra.mrb[0].mxu1 %v26_v33 }
  0x25   :  { %230 = vmatmul.mubr.f32.vlgmr.msra.gmra.mrb[0].mxu0 %v28_v34 }
  0xf7   :  { %v160_v40 = vpop.f32.mrb[0].mxu1 }
  0xf8   :  { %v231_v42 = vpop.f32.mrb[0].mxu0  ;;  %v162_v43 = vpop.f32.mrb[1].mxu1 }
  0xf9   :  { %v232_v45 = vadd.f32 %v231_v42, %v160_v40  ;;  %v233_v46 = vpop.f32.mrb[1].mxu0 }
  0xfa   :  { %v234_v47 = vadd.f32 %v233_v46, %v162_v43 }
  0xfb   :  { %v248_v48 = vadd.f32 %v241_v41, %v232_v45 }
  0xfc   :  { %v249_v49 = vadd.f32 %v245_v44, %v234_v47 }
  0xfd   :  { %263 = vst [vmem:[%s591_s6] sm:$0xff] %v248_v48 }
  0xfe   :  { %251 = vmax.xlane.f32.xlu0 %v249_v49 }
 0x18b   :  { %v252_v50 = vpop.xlane.xlu0 %251 }
 0x18c   :  { %v253_v51 = vsub.f32 %v249_v49, %v252_v50 }
 0x18e   :  { %v254_v52 = vmul.f32 1.442695, %v253_v51 }
 0x190   :  { %339 = vpow2.f32 %v254_v52 }
 0x19a   :  { %v340_v53 = vpop.eup %339 }
 0x19b   :  { %256 = vadd.xlane.f32.xlu0 %v340_v53 }
 0x228   :  { %v257_v54 = vpop.xlane.xlu0 %256 }
 0x229   :  { %341 = vlog2.f32 %v257_v54 }
 0x233   :  { %v342_v55 = vpop.eup %341 }
 0x234   :  { %v259_v56 = vmul.f32 0.6931472, %v342_v55 }
 0x236   :  { %v260_v57 = vsub.f32 %v253_v51, %v259_v56 }
 0x238   :  { %261 = vst [vmem:[%s592_s5] sm:$0xff] %v260_v57 }

</bundles_post_ra>
